<compile_context>
chip_gen: v6e
topology: v6e:2x2x1
jax: 0.10.0
libtpu: 0.0.40
codegen_flags: <defaults>
</compile_context>

<pallas_src>
import functools

import jax
import jax.numpy as jnp
from jax import lax
from jax.experimental import pallas as pl
from jax.experimental.pallas import tpu as pltpu


def lstm_dual_score_kernel(gx_ref, whh_ref, m_ref, out_ref, h_scr, c_scr,
                           *, hidden_size, batch, t_chunk):
    """One grid step == one chunk of `t_chunk` LSTM time steps over 2B rows.

    gx_ref  : (t_chunk, 2B, 4H) f32  precomputed x @ W_ih^T + b for this chunk
    whh_ref : (H, 4H)  bf16          W_hh^T (resident across the grid)
    m_ref   : (H, H)   f32           DualEncoder bilinear matrix M
    out_ref : (B, 1)   f32           scores (written on the last chunk only)
    h_scr   : (2B, H)  f32           carried hidden state
    c_scr   : (2B, H)  f32           carried cell state
    """
    chunk = pl.program_id(0)
    H = hidden_size

    @pl.when(chunk == 0)
    def _():
        h_scr[...] = jnp.zeros_like(h_scr)
        c_scr[...] = jnp.zeros_like(c_scr)

    whh = whh_ref[...]  # (H, 4H) bf16 — hoisted out of the time loop

    def step(t, carry):
        h, c = carry
        # Serial critical path: only the recurrent matmul remains here
        # (input projection was hoisted to the wrapper).
        gates = gx_ref[t] + jnp.dot(h.astype(jnp.bfloat16), whh,
                                    preferred_element_type=jnp.float32)
        # PyTorch gate order: i, f, g, o.
        # NOTE: at H=32 these are sub-128-lane slices; at production H>=128
        # they become free vreg selection.
        i_g = jax.nn.sigmoid(gates[:, 0 * H:1 * H])
        f_g = jax.nn.sigmoid(gates[:, 1 * H:2 * H])
        g_g = jnp.tanh(gates[:, 2 * H:3 * H])
        o_g = jax.nn.sigmoid(gates[:, 3 * H:4 * H])
        c_new = f_g * c + i_g * g_g
        h_new = o_g * jnp.tanh(c_new)
        return h_new, c_new

    h, c = lax.fori_loop(0, t_chunk, step, (h_scr[...], c_scr[...]),
                         unroll=True)
    h_scr[...] = h
    c_scr[...] = c

    @pl.when(chunk == pl.num_programs(0) - 1)
    def _():
        # DualEncoder head: score_b = (ctx_b @ M) . rsp_b
        ctx = h[:batch]    # rows 0..B-1   = context stream last hidden
        rsp = h[batch:]    # rows B..2B-1  = response stream last hidden
        cm = jnp.dot(ctx, m_ref[...], preferred_element_type=jnp.float32)
        out_ref[...] = jnp.sum(cm * rsp, axis=-1,
                               keepdims=True).astype(out_ref.dtype)


def _pick_time_chunk(seq_len, row_bytes, budget_bytes=4 << 20):
    """Largest divisor of seq_len whose double-buffered chunk fits the budget."""
    best = 1
    for t in range(1, seq_len + 1):
        if seq_len % t == 0 and 2 * t * row_bytes <= budget_bytes:
            best = t
    return best


def dual_encoder_forward(context_ids, response_ids, emb_table,
                         w_ih, w_hh, b_ih, b_hh, M,
                         *, p_dropout=0.0, training=False):
    """JAX wrapper reproducing DualEncoder.forward (encoder = Embedding + LSTM).

    context_ids, response_ids : (S, B) int32 (time-major, nn.LSTM default)
    emb_table : (V, E) f32
    w_ih      : (4H, E) f32   (lstm.weight_ih_l0)
    w_hh      : (4H, H) f32   (lstm.weight_hh_l0)
    b_ih,b_hh : (4H,)  f32
    M         : (H, H) f32    DualEncoder bilinear parameter
    returns   : (B, 1) f32 scores
    """
    S, B = context_ids.shape
    if response_ids.shape != (S, B):
        raise ValueError("context/response must share (seq_len, batch); "
                         "TODO(synk): support unequal lengths.")
    H = w_hh.shape[1]

    # --- glue in plain JAX: gather + hoisted input projection ---------------
    tokens = jnp.concatenate([context_ids, response_ids], axis=1)    # (S, 2B)
    emb = jnp.take(emb_table, tokens, axis=0)                        # (S, 2B, E)

    wih_t = jnp.transpose(w_ih)                                      # (E, 4H)
    whh_t = jnp.transpose(w_hh).astype(jnp.bfloat16)                 # (H, 4H)
    bias = (b_ih + b_hh).reshape(1, 1, 4 * H)

    # Hoisted input projection: one big MXU-friendly batched matmul in bf16
    # with f32 accumulation. Removes half the matmul work from the serial loop.
    gates_x = jnp.einsum(
        "sbe,eg->sbg", emb.astype(jnp.bfloat16), wih_t.astype(jnp.bfloat16),
        preferred_element_type=jnp.float32) + bias                   # (S,2B,4H)

    # --- Pallas kernel: whole recurrence + fused score head -----------------
    row_bytes = 2 * B * 4 * H * 4
    t_chunk = _pick_time_chunk(S, row_bytes)
    n_chunks = S // t_chunk

    kernel = functools.partial(lstm_dual_score_kernel,
                               hidden_size=H, batch=B, t_chunk=t_chunk)

    score = pl.pallas_call(
        kernel,
        out_shape=jax.ShapeDtypeStruct((B, 1), jnp.float32),
        grid_spec=pltpu.PrefetchScalarGridSpec(
            num_scalar_prefetch=0,
            grid=(n_chunks,),
            in_specs=[
                pl.BlockSpec((t_chunk, 2 * B, 4 * H), lambda c: (c, 0, 0)),
                pl.BlockSpec((H, 4 * H), lambda c: (0, 0)),
                pl.BlockSpec((H, H), lambda c: (0, 0)),
            ],
            out_specs=pl.BlockSpec((B, 1), lambda c: (0, 0)),
            scratch_shapes=[
                pltpu.VMEM((2 * B, H), jnp.float32),   # h carry
                pltpu.VMEM((2 * B, H), jnp.float32),   # c carry
            ],
        ),
        compiler_params=pltpu.CompilerParams(
            dimension_semantics=("arbitrary",),        # recurrence is serial
            vmem_limit_bytes=32 * 1024 * 1024,         # explicit, v7x-safe
        ),
    )(gates_x, whh_t, M)

    # Dropout on encoder outputs: identity at inference (model.eval()).
    del p_dropout, training
    return score


def _orthogonal(key, shape):
    """Deterministic orthogonal init (rows >= cols), like torch.nn.init.orthogonal."""
    a = jax.random.normal(key, shape, dtype=jnp.float32)
    q, r = jnp.linalg.qr(a)
    d = jnp.sign(jnp.diagonal(r))
    return q * d[None, :]


if __name__ == "__main__":
    vocab_size = 50
    emb_size = 32
    hidden_size = 32
    p_dropout = 0.1
    seq_len = 8
    batch = 8

    key = jax.random.PRNGKey(0)
    k_emb, k_wih, k_whh, k_m, k_ctx, k_rsp = jax.random.split(key, 6)

    # Parameter init mirroring Encoder.init_weights / DualEncoder.__init__:
    #  - embedding: synthetic table (stands in for id_to_vec)
    #  - weight_ih_l0: uniform(-0.01, 0.01)
    #  - weight_hh_l0: orthogonal
    #  - biases: zeros
    #  - M: xavier_normal  (std = sqrt(2 / (fan_in + fan_out)))
    emb_table = jax.random.normal(k_emb, (vocab_size, emb_size),
                                  dtype=jnp.float32)
    w_ih = jax.random.uniform(k_wih, (4 * hidden_size, emb_size),
                              minval=-0.01, maxval=0.01, dtype=jnp.float32)
    w_hh = _orthogonal(k_whh, (4 * hidden_size, hidden_size))
    b_ih = jnp.zeros((4 * hidden_size,), dtype=jnp.float32)
    b_hh = jnp.zeros((4 * hidden_size,), dtype=jnp.float32)
    m_std = (2.0 / (hidden_size + hidden_size)) ** 0.5
    M = m_std * jax.random.normal(k_m, (hidden_size, hidden_size),
                                  dtype=jnp.float32)

    context_ids = jax.random.randint(k_ctx, (seq_len, batch), 0, vocab_size,
                                     dtype=jnp.int32)
    response_ids = jax.random.randint(k_rsp, (seq_len, batch), 0, vocab_size,
                                      dtype=jnp.int32)

    score = dual_encoder_forward(context_ids, response_ids, emb_table,
                                 w_ih, w_hh, b_ih, b_hh, M,
                                 p_dropout=p_dropout, training=False)
    score = jax.block_until_ready(score)
    assert score.shape == (batch, 1)
    assert score.dtype == jnp.float32
    print("KERNEL_OK")
</pallas_src>

<mosaic_0001>
module attributes {stable_mosaic.version = 11 : i64} {
  func.func @lstm_dual_score_kernel(%arg0: i32, %arg1: memref<8x16x128xf32, #tpu.memory_space<vmem>>, %arg2: memref<32x128xbf16, #tpu.memory_space<vmem>>, %arg3: memref<32x32xf32, #tpu.memory_space<vmem>>, %arg4: memref<8x1xf32, #tpu.memory_space<vmem>>, %arg5: memref<16x32xf32, #tpu.memory_space<vmem>>, %arg6: memref<16x32xf32, #tpu.memory_space<vmem>>) attributes {dimension_semantics = [#tpu.dimension_semantics<arbitrary>], iteration_bounds = array<i64: 1>, scalar_prefetch = 0 : i64, scratch_operands = 2 : i64, tpu.core_type = #tpu.core_type<tc>, window_params = [{transform_indices = @transform_0, window_bounds = array<i64: 8, 16, 128>}, {pipeline_mode = #tpu.pipeline_mode<synchronous>, transform_indices = @transform_1, window_bounds = array<i64: 32, 128>}, {pipeline_mode = #tpu.pipeline_mode<synchronous>, transform_indices = @transform_2, window_bounds = array<i64: 32, 32>}, {pipeline_mode = #tpu.pipeline_mode<synchronous>, transform_indices = @transform_3, window_bounds = array<i64: 8, 1>}]} {
    %c0_i32 = arith.constant 0 : i32
    %0 = arith.cmpi eq, %arg0, %c0_i32 : i32
    %1 = arith.extui %0 : i1 to i32
    %c0_i32_0 = arith.constant 0 : i32
    %2 = arith.cmpi ne, %1, %c0_i32_0 : i32
    scf.if %2 {
      %cst_60 = arith.constant 0.000000e+00 : f32
      %259 = vector.broadcast %cst_60 : f32 to vector<16x32xf32>
      %c0_61 = arith.constant 0 : index
      %c0_62 = arith.constant 0 : index
      %260 = vector.load %arg5[%c0_61, %c0_62] : memref<16x32xf32, #tpu.memory_space<vmem>>, vector<16x32xf32>
      tpu.vector_store %arg5[%c0_61, %c0_62], %259 {strides = array<i32>} : memref<16x32xf32, #tpu.memory_space<vmem>>, vector<16x32xf32>,
      %cst_63 = arith.constant 0.000000e+00 : f32
      %261 = vector.broadcast %cst_63 : f32 to vector<16x32xf32>
      %c0_64 = arith.constant 0 : index
      %c0_65 = arith.constant 0 : index
      %262 = vector.load %arg6[%c0_64, %c0_65] : memref<16x32xf32, #tpu.memory_space<vmem>>, vector<16x32xf32>
      tpu.vector_store %arg6[%c0_64, %c0_65], %261 {strides = array<i32>} : memref<16x32xf32, #tpu.memory_space<vmem>>, vector<16x32xf32>,
    } else {
    }
    %c0 = arith.constant 0 : index
    %c0_1 = arith.constant 0 : index
    %3 = vector.load %arg2[%c0, %c0_1] : memref<32x128xbf16, #tpu.memory_space<vmem>>, vector<32x128xbf16>
    %c0_2 = arith.constant 0 : index
    %c0_3 = arith.constant 0 : index
    %4 = vector.load %arg5[%c0_2, %c0_3] : memref<16x32xf32, #tpu.memory_space<vmem>>, vector<16x32xf32>
    %c0_4 = arith.constant 0 : index
    %c0_5 = arith.constant 0 : index
    %5 = vector.load %arg6[%c0_4, %c0_5] : memref<16x32xf32, #tpu.memory_space<vmem>>, vector<16x32xf32>
    %c0_i32_6 = arith.constant 0 : i32
    %6 = arith.index_cast %c0_i32_6 : i32 to index
    %c0_7 = arith.constant 0 : index
    %c0_8 = arith.constant 0 : index
    %7 = vector.load %arg1[%6, %c0_7, %c0_8] : memref<8x16x128xf32, #tpu.memory_space<vmem>>, vector<1x16x128xf32>
    %8 = vector.shape_cast %7 : vector<1x16x128xf32> to vector<16x128xf32>
    %9 = arith.truncf %4 : vector<16x32xf32> to vector<16x32xbf16>
    %cst = arith.constant dense<0.000000e+00> : vector<16x128xf32>
    %10 = tpu.matmul %9, %3, %cst {dimension_numbers = #tpu.dot_dimension_numbers<[1], [0], [0], [1], [0, 0, 1, 1], [], []>} : vector<16x32xbf16>, vector<32x128xbf16>, vector<16x128xf32> -> vector<16x128xf32>
    %11 = arith.addf %8, %10 : vector<16x128xf32>
    %12 = vector.extract_strided_slice %11 {offsets = [0, 0], sizes = [16, 32], strides = [1, 1]} : vector<16x128xf32> to vector<16x32xf32>
    %13 = arith.negf %12 : vector<16x32xf32>
    %14 = math.exp %13 : vector<16x32xf32>
    %cst_9 = arith.constant 1.000000e+00 : f32
    %15 = vector.broadcast %cst_9 : f32 to vector<16x32xf32>
    %16 = arith.addf %15, %14 : vector<16x32xf32>
    %17 = arith.divf %15, %16 : vector<16x32xf32>
    %18 = vector.extract_strided_slice %11 {offsets = [0, 32], sizes = [16, 32], strides = [1, 1]} : vector<16x128xf32> to vector<16x32xf32>
    %19 = arith.negf %18 : vector<16x32xf32>
    %20 = math.exp %19 : vector<16x32xf32>
    %cst_10 = arith.constant 1.000000e+00 : f32
    %21 = vector.broadcast %cst_10 : f32 to vector<16x32xf32>
    %22 = arith.addf %21, %20 : vector<16x32xf32>
    %23 = arith.divf %21, %22 : vector<16x32xf32>
    %24 = vector.extract_strided_slice %11 {offsets = [0, 64], sizes = [16, 32], strides = [1, 1]} : vector<16x128xf32> to vector<16x32xf32>
    %25 = math.tanh %24 : vector<16x32xf32>
    %26 = vector.extract_strided_slice %11 {offsets = [0, 96], sizes = [16, 32], strides = [1, 1]} : vector<16x128xf32> to vector<16x32xf32>
    %27 = arith.negf %26 : vector<16x32xf32>
    %28 = math.exp %27 : vector<16x32xf32>
    %cst_11 = arith.constant 1.000000e+00 : f32
    %29 = vector.broadcast %cst_11 : f32 to vector<16x32xf32>
    %30 = arith.addf %29, %28 : vector<16x32xf32>
    %31 = arith.divf %29, %30 : vector<16x32xf32>
    %32 = arith.mulf %23, %5 : vector<16x32xf32>
    %33 = arith.mulf %17, %25 : vector<16x32xf32>
    %34 = arith.addf %32, %33 : vector<16x32xf32>
    %35 = math.tanh %34 : vector<16x32xf32>
    %36 = arith.mulf %31, %35 : vector<16x32xf32>
    %c1_i32 = arith.constant 1 : i32
    %37 = arith.index_cast %c1_i32 : i32 to index
    %c0_12 = arith.constant 0 : index
    %c0_13 = arith.constant 0 : index
    %38 = vector.load %arg1[%37, %c0_12, %c0_13] : memref<8x16x128xf32, #tpu.memory_space<vmem>>, vector<1x16x128xf32>
    %39 = vector.shape_cast %38 : vector<1x16x128xf32> to vector<16x128xf32>
    %40 = arith.truncf %36 : vector<16x32xf32> to vector<16x32xbf16>
    %cst_14 = arith.constant dense<0.000000e+00> : vector<16x128xf32>
    %41 = tpu.matmul %40, %3, %cst_14 {dimension_numbers = #tpu.dot_dimension_numbers<[1], [0], [0], [1], [0, 0, 1, 1], [], []>} : vector<16x32xbf16>, vector<32x128xbf16>, vector<16x128xf32> -> vector<16x128xf32>
    %42 = arith.addf %39, %41 : vector<16x128xf32>
    %43 = vector.extract_strided_slice %42 {offsets = [0, 0], sizes = [16, 32], strides = [1, 1]} : vector<16x128xf32> to vector<16x32xf32>
    %44 = arith.negf %43 : vector<16x32xf32>
    %45 = math.exp %44 : vector<16x32xf32>
    %cst_15 = arith.constant 1.000000e+00 : f32
    %46 = vector.broadcast %cst_15 : f32 to vector<16x32xf32>
    %47 = arith.addf %46, %45 : vector<16x32xf32>
    %48 = arith.divf %46, %47 : vector<16x32xf32>
    %49 = vector.extract_strided_slice %42 {offsets = [0, 32], sizes = [16, 32], strides = [1, 1]} : vector<16x128xf32> to vector<16x32xf32>
    %50 = arith.negf %49 : vector<16x32xf32>
    %51 = math.exp %50 : vector<16x32xf32>
    %cst_16 = arith.constant 1.000000e+00 : f32
    %52 = vector.broadcast %cst_16 : f32 to vector<16x32xf32>
    %53 = arith.addf %52, %51 : vector<16x32xf32>
    %54 = arith.divf %52, %53 : vector<16x32xf32>
    %55 = vector.extract_strided_slice %42 {offsets = [0, 64], sizes = [16, 32], strides = [1, 1]} : vector<16x128xf32> to vector<16x32xf32>
    %56 = math.tanh %55 : vector<16x32xf32>
    %57 = vector.extract_strided_slice %42 {offsets = [0, 96], sizes = [16, 32], strides = [1, 1]} : vector<16x128xf32> to vector<16x32xf32>
    %58 = arith.negf %57 : vector<16x32xf32>
    %59 = math.exp %58 : vector<16x32xf32>
    %cst_17 = arith.constant 1.000000e+00 : f32
    %60 = vector.broadcast %cst_17 : f32 to vector<16x32xf32>
    %61 = arith.addf %60, %59 : vector<16x32xf32>
    %62 = arith.divf %60, %61 : vector<16x32xf32>
    %63 = arith.mulf %54, %34 : vector<16x32xf32>
    %64 = arith.mulf %48, %56 : vector<16x32xf32>
    %65 = arith.addf %63, %64 : vector<16x32xf32>
    %66 = math.tanh %65 : vector<16x32xf32>
    %67 = arith.mulf %62, %66 : vector<16x32xf32>
    %c2_i32 = arith.constant 2 : i32
    %68 = arith.index_cast %c2_i32 : i32 to index
    %c0_18 = arith.constant 0 : index
    %c0_19 = arith.constant 0 : index
    %69 = vector.load %arg1[%68, %c0_18, %c0_19] : memref<8x16x128xf32, #tpu.memory_space<vmem>>, vector<1x16x128xf32>
    %70 = vector.shape_cast %69 : vector<1x16x128xf32> to vector<16x128xf32>
    %71 = arith.truncf %67 : vector<16x32xf32> to vector<16x32xbf16>
    %cst_20 = arith.constant dense<0.000000e+00> : vector<16x128xf32>
    %72 = tpu.matmul %71, %3, %cst_20 {dimension_numbers = #tpu.dot_dimension_numbers<[1], [0], [0], [1], [0, 0, 1, 1], [], []>} : vector<16x32xbf16>, vector<32x128xbf16>, vector<16x128xf32> -> vector<16x128xf32>
    %73 = arith.addf %70, %72 : vector<16x128xf32>
    %74 = vector.extract_strided_slice %73 {offsets = [0, 0], sizes = [16, 32], strides = [1, 1]} : vector<16x128xf32> to vector<16x32xf32>
    %75 = arith.negf %74 : vector<16x32xf32>
    %76 = math.exp %75 : vector<16x32xf32>
    %cst_21 = arith.constant 1.000000e+00 : f32
    %77 = vector.broadcast %cst_21 : f32 to vector<16x32xf32>
    %78 = arith.addf %77, %76 : vector<16x32xf32>
    %79 = arith.divf %77, %78 : vector<16x32xf32>
    %80 = vector.extract_strided_slice %73 {offsets = [0, 32], sizes = [16, 32], strides = [1, 1]} : vector<16x128xf32> to vector<16x32xf32>
    %81 = arith.negf %80 : vector<16x32xf32>
    %82 = math.exp %81 : vector<16x32xf32>
    %cst_22 = arith.constant 1.000000e+00 : f32
    %83 = vector.broadcast %cst_22 : f32 to vector<16x32xf32>
    %84 = arith.addf %83, %82 : vector<16x32xf32>
    %85 = arith.divf %83, %84 : vector<16x32xf32>
    %86 = vector.extract_strided_slice %73 {offsets = [0, 64], sizes = [16, 32], strides = [1, 1]} : vector<16x128xf32> to vector<16x32xf32>
    %87 = math.tanh %86 : vector<16x32xf32>
    %88 = vector.extract_strided_slice %73 {offsets = [0, 96], sizes = [16, 32], strides = [1, 1]} : vector<16x128xf32> to vector<16x32xf32>
    %89 = arith.negf %88 : vector<16x32xf32>
    %90 = math.exp %89 : vector<16x32xf32>
    %cst_23 = arith.constant 1.000000e+00 : f32
    %91 = vector.broadcast %cst_23 : f32 to vector<16x32xf32>
    %92 = arith.addf %91, %90 : vector<16x32xf32>
    %93 = arith.divf %91, %92 : vector<16x32xf32>
    %94 = arith.mulf %85, %65 : vector<16x32xf32>
    %95 = arith.mulf %79, %87 : vector<16x32xf32>
    %96 = arith.addf %94, %95 : vector<16x32xf32>
    %97 = math.tanh %96 : vector<16x32xf32>
    %98 = arith.mulf %93, %97 : vector<16x32xf32>
    %c3_i32 = arith.constant 3 : i32
    %99 = arith.index_cast %c3_i32 : i32 to index
    %c0_24 = arith.constant 0 : index
    %c0_25 = arith.constant 0 : index
    %100 = vector.load %arg1[%99, %c0_24, %c0_25] : memref<8x16x128xf32, #tpu.memory_space<vmem>>, vector<1x16x128xf32>
    %101 = vector.shape_cast %100 : vector<1x16x128xf32> to vector<16x128xf32>
    %102 = arith.truncf %98 : vector<16x32xf32> to vector<16x32xbf16>
    %cst_26 = arith.constant dense<0.000000e+00> : vector<16x128xf32>
    %103 = tpu.matmul %102, %3, %cst_26 {dimension_numbers = #tpu.dot_dimension_numbers<[1], [0], [0], [1], [0, 0, 1, 1], [], []>} : vector<16x32xbf16>, vector<32x128xbf16>, vector<16x128xf32> -> vector<16x128xf32>
    %104 = arith.addf %101, %103 : vector<16x128xf32>
    %105 = vector.extract_strided_slice %104 {offsets = [0, 0], sizes = [16, 32], strides = [1, 1]} : vector<16x128xf32> to vector<16x32xf32>
    %106 = arith.negf %105 : vector<16x32xf32>
    %107 = math.exp %106 : vector<16x32xf32>
    %cst_27 = arith.constant 1.000000e+00 : f32
    %108 = vector.broadcast %cst_27 : f32 to vector<16x32xf32>
    %109 = arith.addf %108, %107 : vector<16x32xf32>
    %110 = arith.divf %108, %109 : vector<16x32xf32>
    %111 = vector.extract_strided_slice %104 {offsets = [0, 32], sizes = [16, 32], strides = [1, 1]} : vector<16x128xf32> to vector<16x32xf32>
    %112 = arith.negf %111 : vector<16x32xf32>
    %113 = math.exp %112 : vector<16x32xf32>
    %cst_28 = arith.constant 1.000000e+00 : f32
    %114 = vector.broadcast %cst_28 : f32 to vector<16x32xf32>
    %115 = arith.addf %114, %113 : vector<16x32xf32>
    %116 = arith.divf %114, %115 : vector<16x32xf32>
    %117 = vector.extract_strided_slice %104 {offsets = [0, 64], sizes = [16, 32], strides = [1, 1]} : vector<16x128xf32> to vector<16x32xf32>
    %118 = math.tanh %117 : vector<16x32xf32>
    %119 = vector.extract_strided_slice %104 {offsets = [0, 96], sizes = [16, 32], strides = [1, 1]} : vector<16x128xf32> to vector<16x32xf32>
    %120 = arith.negf %119 : vector<16x32xf32>
    %121 = math.exp %120 : vector<16x32xf32>
    %cst_29 = arith.constant 1.000000e+00 : f32
    %122 = vector.broadcast %cst_29 : f32 to vector<16x32xf32>
    %123 = arith.addf %122, %121 : vector<16x32xf32>
    %124 = arith.divf %122, %123 : vector<16x32xf32>
    %125 = arith.mulf %116, %96 : vector<16x32xf32>
    %126 = arith.mulf %110, %118 : vector<16x32xf32>
    %127 = arith.addf %125, %126 : vector<16x32xf32>
    %128 = math.tanh %127 : vector<16x32xf32>
    %129 = arith.mulf %124, %128 : vector<16x32xf32>
    %c4_i32 = arith.constant 4 : i32
    %130 = arith.index_cast %c4_i32 : i32 to index
    %c0_30 = arith.constant 0 : index
    %c0_31 = arith.constant 0 : index
    %131 = vector.load %arg1[%130, %c0_30, %c0_31] : memref<8x16x128xf32, #tpu.memory_space<vmem>>, vector<1x16x128xf32>
    %132 = vector.shape_cast %131 : vector<1x16x128xf32> to vector<16x128xf32>
    %133 = arith.truncf %129 : vector<16x32xf32> to vector<16x32xbf16>
    %cst_32 = arith.constant dense<0.000000e+00> : vector<16x128xf32>
    %134 = tpu.matmul %133, %3, %cst_32 {dimension_numbers = #tpu.dot_dimension_numbers<[1], [0], [0], [1], [0, 0, 1, 1], [], []>} : vector<16x32xbf16>, vector<32x128xbf16>, vector<16x128xf32> -> vector<16x128xf32>
    %135 = arith.addf %132, %134 : vector<16x128xf32>
    %136 = vector.extract_strided_slice %135 {offsets = [0, 0], sizes = [16, 32], strides = [1, 1]} : vector<16x128xf32> to vector<16x32xf32>
    %137 = arith.negf %136 : vector<16x32xf32>
    %138 = math.exp %137 : vector<16x32xf32>
    %cst_33 = arith.constant 1.000000e+00 : f32
    %139 = vector.broadcast %cst_33 : f32 to vector<16x32xf32>
    %140 = arith.addf %139, %138 : vector<16x32xf32>
    %141 = arith.divf %139, %140 : vector<16x32xf32>
    %142 = vector.extract_strided_slice %135 {offsets = [0, 32], sizes = [16, 32], strides = [1, 1]} : vector<16x128xf32> to vector<16x32xf32>
    %143 = arith.negf %142 : vector<16x32xf32>
    %144 = math.exp %143 : vector<16x32xf32>
    %cst_34 = arith.constant 1.000000e+00 : f32
    %145 = vector.broadcast %cst_34 : f32 to vector<16x32xf32>
    %146 = arith.addf %145, %144 : vector<16x32xf32>
    %147 = arith.divf %145, %146 : vector<16x32xf32>
    %148 = vector.extract_strided_slice %135 {offsets = [0, 64], sizes = [16, 32], strides = [1, 1]} : vector<16x128xf32> to vector<16x32xf32>
    %149 = math.tanh %148 : vector<16x32xf32>
    %150 = vector.extract_strided_slice %135 {offsets = [0, 96], sizes = [16, 32], strides = [1, 1]} : vector<16x128xf32> to vector<16x32xf32>
    %151 = arith.negf %150 : vector<16x32xf32>
    %152 = math.exp %151 : vector<16x32xf32>
    %cst_35 = arith.constant 1.000000e+00 : f32
    %153 = vector.broadcast %cst_35 : f32 to vector<16x32xf32>
    %154 = arith.addf %153, %152 : vector<16x32xf32>
    %155 = arith.divf %153, %154 : vector<16x32xf32>
    %156 = arith.mulf %147, %127 : vector<16x32xf32>
    %157 = arith.mulf %141, %149 : vector<16x32xf32>
    %158 = arith.addf %156, %157 : vector<16x32xf32>
    %159 = math.tanh %158 : vector<16x32xf32>
    %160 = arith.mulf %155, %159 : vector<16x32xf32>
    %c5_i32 = arith.constant 5 : i32
    %161 = arith.index_cast %c5_i32 : i32 to index
    %c0_36 = arith.constant 0 : index
    %c0_37 = arith.constant 0 : index
    %162 = vector.load %arg1[%161, %c0_36, %c0_37] : memref<8x16x128xf32, #tpu.memory_space<vmem>>, vector<1x16x128xf32>
    %163 = vector.shape_cast %162 : vector<1x16x128xf32> to vector<16x128xf32>
    %164 = arith.truncf %160 : vector<16x32xf32> to vector<16x32xbf16>
    %cst_38 = arith.constant dense<0.000000e+00> : vector<16x128xf32>
    %165 = tpu.matmul %164, %3, %cst_38 {dimension_numbers = #tpu.dot_dimension_numbers<[1], [0], [0], [1], [0, 0, 1, 1], [], []>} : vector<16x32xbf16>, vector<32x128xbf16>, vector<16x128xf32> -> vector<16x128xf32>
    %166 = arith.addf %163, %165 : vector<16x128xf32>
    %167 = vector.extract_strided_slice %166 {offsets = [0, 0], sizes = [16, 32], strides = [1, 1]} : vector<16x128xf32> to vector<16x32xf32>
    %168 = arith.negf %167 : vector<16x32xf32>
    %169 = math.exp %168 : vector<16x32xf32>
    %cst_39 = arith.constant 1.000000e+00 : f32
    %170 = vector.broadcast %cst_39 : f32 to vector<16x32xf32>
    %171 = arith.addf %170, %169 : vector<16x32xf32>
    %172 = arith.divf %170, %171 : vector<16x32xf32>
    %173 = vector.extract_strided_slice %166 {offsets = [0, 32], sizes = [16, 32], strides = [1, 1]} : vector<16x128xf32> to vector<16x32xf32>
    %174 = arith.negf %173 : vector<16x32xf32>
    %175 = math.exp %174 : vector<16x32xf32>
    %cst_40 = arith.constant 1.000000e+00 : f32
    %176 = vector.broadcast %cst_40 : f32 to vector<16x32xf32>
    %177 = arith.addf %176, %175 : vector<16x32xf32>
    %178 = arith.divf %176, %177 : vector<16x32xf32>
    %179 = vector.extract_strided_slice %166 {offsets = [0, 64], sizes = [16, 32], strides = [1, 1]} : vector<16x128xf32> to vector<16x32xf32>
    %180 = math.tanh %179 : vector<16x32xf32>
    %181 = vector.extract_strided_slice %166 {offsets = [0, 96], sizes = [16, 32], strides = [1, 1]} : vector<16x128xf32> to vector<16x32xf32>
    %182 = arith.negf %181 : vector<16x32xf32>
    %183 = math.exp %182 : vector<16x32xf32>
    %cst_41 = arith.constant 1.000000e+00 : f32
    %184 = vector.broadcast %cst_41 : f32 to vector<16x32xf32>
    %185 = arith.addf %184, %183 : vector<16x32xf32>
    %186 = arith.divf %184, %185 : vector<16x32xf32>
    %187 = arith.mulf %178, %158 : vector<16x32xf32>
    %188 = arith.mulf %172, %180 : vector<16x32xf32>
    %189 = arith.addf %187, %188 : vector<16x32xf32>
    %190 = math.tanh %189 : vector<16x32xf32>
    %191 = arith.mulf %186, %190 : vector<16x32xf32>
    %c6_i32 = arith.constant 6 : i32
    %192 = arith.index_cast %c6_i32 : i32 to index
    %c0_42 = arith.constant 0 : index
    %c0_43 = arith.constant 0 : index
    %193 = vector.load %arg1[%192, %c0_42, %c0_43] : memref<8x16x128xf32, #tpu.memory_space<vmem>>, vector<1x16x128xf32>
    %194 = vector.shape_cast %193 : vector<1x16x128xf32> to vector<16x128xf32>
    %195 = arith.truncf %191 : vector<16x32xf32> to vector<16x32xbf16>
    %cst_44 = arith.constant dense<0.000000e+00> : vector<16x128xf32>
    %196 = tpu.matmul %195, %3, %cst_44 {dimension_numbers = #tpu.dot_dimension_numbers<[1], [0], [0], [1], [0, 0, 1, 1], [], []>} : vector<16x32xbf16>, vector<32x128xbf16>, vector<16x128xf32> -> vector<16x128xf32>
    %197 = arith.addf %194, %196 : vector<16x128xf32>
    %198 = vector.extract_strided_slice %197 {offsets = [0, 0], sizes = [16, 32], strides = [1, 1]} : vector<16x128xf32> to vector<16x32xf32>
    %199 = arith.negf %198 : vector<16x32xf32>
    %200 = math.exp %199 : vector<16x32xf32>
    %cst_45 = arith.constant 1.000000e+00 : f32
    %201 = vector.broadcast %cst_45 : f32 to vector<16x32xf32>
    %202 = arith.addf %201, %200 : vector<16x32xf32>
    %203 = arith.divf %201, %202 : vector<16x32xf32>
    %204 = vector.extract_strided_slice %197 {offsets = [0, 32], sizes = [16, 32], strides = [1, 1]} : vector<16x128xf32> to vector<16x32xf32>
    %205 = arith.negf %204 : vector<16x32xf32>
    %206 = math.exp %205 : vector<16x32xf32>
    %cst_46 = arith.constant 1.000000e+00 : f32
    %207 = vector.broadcast %cst_46 : f32 to vector<16x32xf32>
    %208 = arith.addf %207, %206 : vector<16x32xf32>
    %209 = arith.divf %207, %208 : vector<16x32xf32>
    %210 = vector.extract_strided_slice %197 {offsets = [0, 64], sizes = [16, 32], strides = [1, 1]} : vector<16x128xf32> to vector<16x32xf32>
    %211 = math.tanh %210 : vector<16x32xf32>
    %212 = vector.extract_strided_slice %197 {offsets = [0, 96], sizes = [16, 32], strides = [1, 1]} : vector<16x128xf32> to vector<16x32xf32>
    %213 = arith.negf %212 : vector<16x32xf32>
    %214 = math.exp %213 : vector<16x32xf32>
    %cst_47 = arith.constant 1.000000e+00 : f32
    %215 = vector.broadcast %cst_47 : f32 to vector<16x32xf32>
    %216 = arith.addf %215, %214 : vector<16x32xf32>
    %217 = arith.divf %215, %216 : vector<16x32xf32>
    %218 = arith.mulf %209, %189 : vector<16x32xf32>
    %219 = arith.mulf %203, %211 : vector<16x32xf32>
    %220 = arith.addf %218, %219 : vector<16x32xf32>
    %221 = math.tanh %220 : vector<16x32xf32>
    %222 = arith.mulf %217, %221 : vector<16x32xf32>
    %c7_i32 = arith.constant 7 : i32
    %223 = arith.index_cast %c7_i32 : i32 to index
    %c0_48 = arith.constant 0 : index
    %c0_49 = arith.constant 0 : index
    %224 = vector.load %arg1[%223, %c0_48, %c0_49] : memref<8x16x128xf32, #tpu.memory_space<vmem>>, vector<1x16x128xf32>
    %225 = vector.shape_cast %224 : vector<1x16x128xf32> to vector<16x128xf32>
    %226 = arith.truncf %222 : vector<16x32xf32> to vector<16x32xbf16>
    %cst_50 = arith.constant dense<0.000000e+00> : vector<16x128xf32>
    %227 = tpu.matmul %226, %3, %cst_50 {dimension_numbers = #tpu.dot_dimension_numbers<[1], [0], [0], [1], [0, 0, 1, 1], [], []>} : vector<16x32xbf16>, vector<32x128xbf16>, vector<16x128xf32> -> vector<16x128xf32>
    %228 = arith.addf %225, %227 : vector<16x128xf32>
    %229 = vector.extract_strided_slice %228 {offsets = [0, 0], sizes = [16, 32], strides = [1, 1]} : vector<16x128xf32> to vector<16x32xf32>
    %230 = arith.negf %229 : vector<16x32xf32>
    %231 = math.exp %230 : vector<16x32xf32>
    %cst_51 = arith.constant 1.000000e+00 : f32
    %232 = vector.broadcast %cst_51 : f32 to vector<16x32xf32>
    %233 = arith.addf %232, %231 : vector<16x32xf32>
    %234 = arith.divf %232, %233 : vector<16x32xf32>
    %235 = vector.extract_strided_slice %228 {offsets = [0, 32], sizes = [16, 32], strides = [1, 1]} : vector<16x128xf32> to vector<16x32xf32>
    %236 = arith.negf %235 : vector<16x32xf32>
    %237 = math.exp %236 : vector<16x32xf32>
    %cst_52 = arith.constant 1.000000e+00 : f32
    %238 = vector.broadcast %cst_52 : f32 to vector<16x32xf32>
    %239 = arith.addf %238, %237 : vector<16x32xf32>
    %240 = arith.divf %238, %239 : vector<16x32xf32>
    %241 = vector.extract_strided_slice %228 {offsets = [0, 64], sizes = [16, 32], strides = [1, 1]} : vector<16x128xf32> to vector<16x32xf32>
    %242 = math.tanh %241 : vector<16x32xf32>
    %243 = vector.extract_strided_slice %228 {offsets = [0, 96], sizes = [16, 32], strides = [1, 1]} : vector<16x128xf32> to vector<16x32xf32>
    %244 = arith.negf %243 : vector<16x32xf32>
    %245 = math.exp %244 : vector<16x32xf32>
    %cst_53 = arith.constant 1.000000e+00 : f32
    %246 = vector.broadcast %cst_53 : f32 to vector<16x32xf32>
    %247 = arith.addf %246, %245 : vector<16x32xf32>
    %248 = arith.divf %246, %247 : vector<16x32xf32>
    %249 = arith.mulf %240, %220 : vector<16x32xf32>
    %250 = arith.mulf %234, %242 : vector<16x32xf32>
    %251 = arith.addf %249, %250 : vector<16x32xf32>
    %252 = math.tanh %251 : vector<16x32xf32>
    %253 = arith.mulf %248, %252 : vector<16x32xf32>
    %c8_i32 = arith.constant 8 : i32
    %c0_54 = arith.constant 0 : index
    %c0_55 = arith.constant 0 : index
    %254 = vector.load %arg5[%c0_54, %c0_55] : memref<16x32xf32, #tpu.memory_space<vmem>>, vector<16x32xf32>
    tpu.vector_store %arg5[%c0_54, %c0_55], %253 {strides = array<i32>} : memref<16x32xf32, #tpu.memory_space<vmem>>, vector<16x32xf32>,
    %c0_56 = arith.constant 0 : index
    %c0_57 = arith.constant 0 : index
    %255 = vector.load %arg6[%c0_56, %c0_57] : memref<16x32xf32, #tpu.memory_space<vmem>>, vector<16x32xf32>
    tpu.vector_store %arg6[%c0_56, %c0_57], %251 {strides = array<i32>} : memref<16x32xf32, #tpu.memory_space<vmem>>, vector<16x32xf32>,
    %c0_i32_58 = arith.constant 0 : i32
    %256 = arith.cmpi eq, %arg0, %c0_i32_58 : i32
    %257 = arith.extui %256 : i1 to i32
    %c0_i32_59 = arith.constant 0 : i32
    %258 = arith.cmpi ne, %257, %c0_i32_59 : i32
    scf.if %258 {
      %259 = vector.extract_strided_slice %253 {offsets = [0, 0], sizes = [8, 32], strides = [1, 1]} : vector<16x32xf32> to vector<8x32xf32>
      %260 = vector.extract_strided_slice %253 {offsets = [8, 0], sizes = [8, 32], strides = [1, 1]} : vector<16x32xf32> to vector<8x32xf32>
      %c0_60 = arith.constant 0 : index
      %c0_61 = arith.constant 0 : index
      %261 = vector.load %arg3[%c0_60, %c0_61] : memref<32x32xf32, #tpu.memory_space<vmem>>, vector<32x32xf32>
      %cst_62 = arith.constant dense<0.000000e+00> : vector<8x32xf32>
      %262 = tpu.matmul %259, %261, %cst_62 {dimension_numbers = #tpu.dot_dimension_numbers<[1], [0], [0], [1], [0, 0, 1, 1], [], []>} : vector<8x32xf32>, vector<32x32xf32>, vector<8x32xf32> -> vector<8x32xf32>
      %263 = arith.mulf %262, %260 : vector<8x32xf32>
      %cst_63 = arith.constant dense<0.000000e+00> : vector<8xf32>
      %264 = vector.multi_reduction <add>, %263, %cst_63 [1] : vector<8x32xf32> to vector<8xf32>
      %265 = vector.shape_cast %264 : vector<8xf32> to vector<8x1xf32>
      %c0_64 = arith.constant 0 : index
      %c0_65 = arith.constant 0 : index
      %266 = vector.load %arg4[%c0_64, %c0_65] : memref<8x1xf32, #tpu.memory_space<vmem>>, vector<8x1xf32>
      tpu.vector_store %arg4[%c0_64, %c0_65], %265 {strides = array<i32>} : memref<8x1xf32, #tpu.memory_space<vmem>>, vector<8x1xf32>,
    } else {
    }
    return
  }
  func.func @transform_0(%arg0: i32) -> (i32, i32, i32) {
    %c0_i32 = arith.constant 0 : i32
    %c0_i32_0 = arith.constant 0 : i32
    %c0_i32_1 = arith.constant 0 : i32
    return %arg0, %c0_i32, %c0_i32_0 : i32, i32, i32
  }
  func.func @transform_1(%arg0: i32) -> (i32, i32) {
    %c0_i32 = arith.constant 0 : i32
    %c0_i32_0 = arith.constant 0 : i32
    %c0_i32_1 = arith.constant 0 : i32
    return %c0_i32, %c0_i32_0 : i32, i32
  }
  func.func @transform_2(%arg0: i32) -> (i32, i32) {
    %c0_i32 = arith.constant 0 : i32
    %c0_i32_0 = arith.constant 0 : i32
    %c0_i32_1 = arith.constant 0 : i32
    return %c0_i32, %c0_i32_0 : i32, i32
  }
  func.func @transform_3(%arg0: i32) -> (i32, i32) {
    %c0_i32 = arith.constant 0 : i32
    %c0_i32_0 = arith.constant 0 : i32
    %c0_i32_1 = arith.constant 0 : i32
    return %c0_i32, %c0_i32_0 : i32, i32
  }
}

</mosaic_0001>

<bundles_post_ra>
// kernel: tpu_custom_call.1
= control target key start
LH: loop header
LB: loop body
LE: loop exit
PB: predicated region body
PF: predicated region fallthrough
CT: control target
= control target key end

     0   :  { %8 = vsyncpa [#allocation5], 0  ;;  %s1533_s0 = inlined_call_operand.hbm [shape: f32[8,16,128], index: 0, kind: input, shape index: {}]   ;;  %s1534_s1 = inlined_call_operand.hbm [shape: bf16[32,128], index: 1, kind: input, shape index: {}]   ;;  %s1535_s2 = inlined_call_operand.hbm [shape: f32[32,32], index: 2, kind: input, shape index: {}]   ;;  %s1536_s3 = inlined_call_operand.vmem [shape: f32[8,1], index: 3, kind: output, shape index: {}]  }
   0x1   :  { %9 = vsyncpa [#allocation7], 0  ;;  %s1345_s12 = smov [#allocation6]  }
   0x2   :  { %s27_s13 = sshll.u32 %s1345_s12, 4  ;;  %s28_s13 = int_to_ptr.vmem [resolvable:$true] %s27_s13 }
   0x3   :  { %s1289_s14 = scalar_lea.vmem %s28_s13, 256  ;;  %p1294_p1 = scmp.lt.s32.totalorder %s28_s13, %s28_s13 }
   0x4   :  { %p1290_p0 = scmp.ne.s32.totalorder %s28_s13, %s1289_s14  ;;  %p1295_p2 = scmp.lt.s32.totalorder %s1289_s14, %s1289_s14 }
   0x6   :  { %p1296_p3 = por %p1295_p2, %p1294_p1 }
   0x8   :  { %p1297_p4 = pnand %p1296_p3, %p1290_p0 }
   0xa   :  { %1300 = shalt.err (!%p1297_p4)
}
   0xb   :  { %s1346_s15 = smov 64   ;;  %s1347_s16 = smov 4  }
   0xc   :  { %33 = dma.hbm_to_vmem [thread:$0]  %s1534_s1, 256, %s28_s13, [#allocation7], %s1346_s15, %s1346_s15, %s1347_s16  }
   0xd   :  { %s1348_s19 = smov [#allocation4]  }
   0xe   :  { %s15_s20 = sshll.u32 %s1348_s19, 4  ;;  %s16_s20 = int_to_ptr.vmem [resolvable:$true] %s15_s20 }
   0xf   :  { %s1309_s21 = scalar_lea.vmem %s16_s20, 2048  ;;  %p1314_p6 = scmp.lt.s32.totalorder %s16_s20, %s16_s20 }
  0x10   :  { %p1310_p5 = scmp.ne.s32.totalorder %s16_s20, %s1309_s21  ;;  %p1315_p7 = scmp.lt.s32.totalorder %s1309_s21, %s1309_s21 }
  0x12   :  { %p1316_p8 = por %p1315_p7, %p1314_p6 }
  0x14   :  { %p1317_p9 = pnand %p1316_p8, %p1310_p5 }
  0x16   :  { %1320 = shalt.err (!%p1317_p9)
}
  0x17   :  { %s1349_s22 = smov 128   ;;  %s1350_s23 = smov 8  }
  0x18   :  { %21 = dma.hbm_to_vmem [thread:$0]  %s1533_s0, 2048, %s16_s20, [#allocation5], %s1349_s22, %s1349_s22, %s1350_s23  }
  0x19   :  { %s1351_s26 = smov [#allocation8]  }
  0x1a   :  { %s39_s27 = sshll.u32 %s1351_s26, 4  ;;  %s40_s27 = int_to_ptr.vmem [resolvable:$true] %s39_s27 }
  0x1b   :  { %s1329_s1 = scalar_lea.vmem %s40_s27, 512  ;;  %p1334_p11 = scmp.lt.s32.totalorder %s40_s27, %s40_s27 }
  0x1c   :  { %p1330_p10 = scmp.ne.s32.totalorder %s40_s27, %s1329_s1  ;;  %p1335_p12 = scmp.lt.s32.totalorder %s1329_s1, %s1329_s1 }
  0x1e   :  { %p1336_p13 = por %p1335_p12, %p1334_p11 }
  0x20   :  { %p1337_p0 = pnand %p1336_p13, %p1330_p10 }
  0x22   :  { %1340 = shalt.err (!%p1337_p0)
}
  0x23   :  { %45 = dma.hbm_to_vmem [thread:$0]  %s1535_s2, 512, %s40_s27, [#allocation7], %s1349_s22, %s1349_s22, %s1350_s23  }
  0x24   :  { %1341 = dma.done.wait [#allocation5], 2048  }
  0x25   :  { %1342 = vsyncadd [#allocation5], 4294965248 }
  0x26   :  { %1343 = dma.done.wait [#allocation7], 768  }
  0x27   :  { %1344 = vsyncadd [#allocation7], 4294966528  ;;  %vm60_vm0 = vcmask 261120   ;;  %v1352_v0 = vmov 0.0   ;;  %vm1353_vm1 = vmmov 0   ;;  %v1401_v1 = vld [vmem:[#allocation6 + $0x8] sm:$0xff]  }
  0x28   :  { %1065 = vmatprep.subr.bf16.mxu0 %v1352_v0  ;;  %1069 = vmatprep.mubr.msk.bf16.mxu0 %vm1353_vm1, %v1352_v0  ;;  %61 = vst.msk [vmem:[#allocation2] sm:$0xff] %vm60_vm0, %v1352_v0  ;;  %62 = vst.msk [vmem:[#allocation2 + $0x8] sm:$0xff] %vm60_vm0, %v1352_v0  ;;  %v1403_v2 = vld [vmem:[#allocation6] sm:$0xff]   ;;  %s1354_s0 = smov 32   ;;  %v74_v12 = vld [vmem:[#allocation4 + $0x8] sm:$0xff]  ;;  %s1355_s2 = smov 96  }
  0x29   :  { %63 = vst.msk [vmem:[#allocation3] sm:$0xff] %vm60_vm0, %v1352_v0  ;;  %64 = vst.msk [vmem:[#allocation3 + $0x8] sm:$0xff] %vm60_vm0, %v1352_v0  ;;  %1073 = vmatprep.subr.bf16.mxu1 %v1352_v0  ;;  %1077 = vmatprep.mubr.msk.bf16.mxu1 %vm1353_vm1, %v1352_v0  ;;  %v73_v8 = vld [vmem:[#allocation4] sm:$0xff]  ;;  %v192_v46 = vld [vmem:[#allocation4 + $0x10] sm:$0xff]  ;;  %vm1001_vm2 = vcmask 7168  }
  0x2a   :  { %1066 = vmatpush3.bf16.msra.mxu0 %v1401_v1  ;;  %1074 = vmatpush3.bf16.msra.mxu1 %v1401_v1  ;;  %v193_v50 = vld [vmem:[#allocation4 + $0x18] sm:$0xff] }
  0x2b   :  { %1067 = vmatprep.subr.bf16.mxu0 %v1352_v0  ;;  %1075 = vmatprep.subr.bf16.mxu1 %v1352_v0 }
  0x2e   :  { %1068 = vmatpush3.bf16.msra.mxu0 %v1403_v2  ;;  %1076 = vmatpush3.bf16.msra.mxu1 %v1403_v2 }
  0x2f   :  { %v69_v3 = vld [vmem:[#allocation2] sm:$0xff]  ;;  %v70_v4 = vld [vmem:[#allocation2 + $0x8] sm:$0xff]  ;;  %1081 = vmatprep.subr.bf16.mxu0 %v1352_v0  ;;  %1089 = vmatprep.subr.bf16.mxu1 %v1352_v0 }
  0x30   :  { %v71_v5 = vld [vmem:[#allocation3] sm:$0xff]  ;;  %v72_v6 = vld [vmem:[#allocation3 + $0x8] sm:$0xff]  ;;  %v75_v7 = vpack.c.bf16 %v70_v4, %v69_v3 }
  0x31   :  { %151 = vrot.lane.b32.xlu1 %v71_v5, %s1354_s0 }
  0x32   :  { %1070 = vmatmul.mubr.msk.bf16.vlgmr.msra.gmra.mxu0 %vm60_vm0, %v75_v7 }
  0x33   :  { %1082 = vmatpush3.bf16.msra.mxu0 %v1401_v1  ;;  %1085 = vmatprep.mubr.msk.bf16.mxu0 %vm1353_vm1, %v1352_v0 }
  0x34   :  { %1083 = vmatprep.subr.bf16.mxu0 %v1352_v0 }
  0x35   :  { %153 = vrot.lane.b32.xlu1 %v72_v6, %s1354_s0 }
  0x37   :  { %1084 = vmatpush3.bf16.msra.mxu0 %v1403_v2 }
  0x38   :  { %1097 = vmatprep.subr.bf16.mxu0 %v1352_v0 }
  0xa3   :  { %v152_v30 = vpop.permute.xlu1 %151 }
  0xa7   :  { %v154_v32 = vpop.permute.xlu1 %153 }
  0xf2   :  { %v126_v9 = vpop.f32.mrf.mxu0 }
  0xf3   :  { %v133_v10 = vadd.f32 %v126_v9, %v73_v8 }
  0xf4   :  { %v1071_v11 = vpop.f32.mrf.mxu0 }
  0xf5   :  { %1153 = vtanh.f32 %v133_v10  ;;  %v1012_v18 = vmul.f32 -1.442695, %v133_v10 }
  0xf6   :  { %v129_v13 = vpop.f32.mrf.mxu0 }
  0xf7   :  { %v134_v14 = vadd.f32 %v129_v13, %v74_v12 }
  0xf8   :  { %v1072_v15 = vpop.f32.mrf.mxu0 }
  0xf9   :  { %1155 = vtanh.f32 %v134_v14  ;;  %v1013_v19 = vmul.f32 -1.442695, %v134_v14 }
  0xfa   :  { %1157 = vpow2.f32 %v1012_v18 }
  0xfb   :  { %1159 = vpow2.f32 %v1013_v19 }
 0x102   :  { %v1154_v16 = vpop.eup %1153 }
 0x103   :  { %161 = vrot.lane.b32.xlu0 %v1154_v16, %s1346_s15 }
 0x106   :  { %v1156_v17 = vpop.eup %1155 }
 0x107   :  { %163 = vrot.lane.b32.xlu0 %v1156_v17, %s1346_s15  ;;  %v1158_v20 = vpop.eup %1157 }
 0x108   :  { %v141_v21 = vadd.f32 1.0, %v1158_v20  ;;  %v1160_v22 = vpop.eup %1159 }
 0x109   :  { %v142_v23 = vadd.f32 1.0, %v1160_v22 }
 0x10a   :  { %1161 = vrcp.f32 %v141_v21  ;;  %v293_v21 = vld [vmem:[#allocation4 + $0x20] sm:$0xff] }
 0x10b   :  { %1163 = vrcp.f32 %v142_v23 }
 0x117   :  { %v1162_v24 = vpop.eup %1161 }
 0x118   :  { %v1164_v27 = vpop.eup %1163  ;;  %v157_v31 = vmul.f32 %v1162_v24, %v152_v30 }
 0x119   :  { %v158_v35 = vmul.f32 %v1164_v27, %v154_v32 }
 0x175   :  { %v162_v25 = vpop.permute.xlu0 %161 }
 0x176   :  { %v167_v26 = vmul.f32 %v1162_v24, %v162_v25  ;;  %v294_v25 = vld [vmem:[#allocation4 + $0x28] sm:$0xff] }
 0x178   :  { %171 = vrot.lane.b32.xlu0 %v167_v26, %s1354_s0 }
 0x179   :  { %v164_v28 = vpop.permute.xlu0 %163 }
 0x17a   :  { %v168_v29 = vmul.f32 %v1164_v27, %v164_v28 }
 0x17c   :  { %173 = vrot.lane.b32.xlu1 %v168_v29, %s1354_s0 }
 0x1ea   :  { %v172_v33 = vpop.permute.xlu0 %171 }
 0x1eb   :  { %v177_v34 = vadd.f32 %v172_v33, %v157_v31 }
 0x1ed   :  { %1165 = vtanh.f32 %v177_v34 }
 0x1ee   :  { %v174_v36 = vpop.permute.xlu1 %173 }
 0x1ef   :  { %v178_v37 = vadd.f32 %v174_v36, %v158_v35 }
 0x1f1   :  { %1167 = vtanh.f32 %v178_v37 }
 0x1fa   :  { %v1166_v38 = vpop.eup %1165 }
 0x1fb   :  { %183 = vrot.lane.b32.xlu0 %v1166_v38, %s1346_s15 }
 0x1fe   :  { %v1168_v39 = vpop.eup %1167 }
 0x1ff   :  { %185 = vrot.lane.b32.xlu1 %v1168_v39, %s1346_s15 }
 0x26d   :  { %v184_v40 = vpop.permute.xlu0 %183 }
 0x26e   :  { %v189_v42 = vmul.f32 %v1162_v24, %v184_v40 }
 0x271   :  { %v186_v41 = vpop.permute.xlu1 %185 }
 0x272   :  { %v190_v43 = vmul.f32 %v1164_v27, %v186_v41 }
 0x274   :  { %v194_v44 = vpack.c.bf16 %v190_v43, %v189_v42 }
 0x276   :  { %196 = vrot.lane.b32.xlu0 %v194_v44, %s1354_s0 }
 0x2e8   :  { %v197_v45 = vpop.permute.xlu0 %196 }
 0x2e9   :  { %1078 = vmatmul.mubr.msk.bf16.vlgmr.msra.gmra.mxu1 %vm60_vm0, %v197_v45 }
 0x2ea   :  { %1090 = vmatpush3.bf16.msra.mxu1 %v1401_v1  ;;  %1093 = vmatprep.mubr.msk.bf16.mxu1 %vm1353_vm1, %v1352_v0 }
 0x2eb   :  { %1091 = vmatprep.subr.bf16.mxu1 %v1352_v0 }
 0x2ee   :  { %1092 = vmatpush3.bf16.msra.mxu1 %v1403_v2 }
 0x2ef   :  { %1105 = vmatprep.subr.bf16.mxu1 %v1352_v0 }
 0x3a9   :  { %v235_v47 = vpop.f32.mrf.mxu1 }
 0x3aa   :  { %v242_v48 = vadd.f32 %v235_v47, %v192_v46 }
 0x3ab   :  { %v1079_v49 = vpop.f32.mrf.mxu1 }
 0x3ac   :  { %1169 = vtanh.f32 %v242_v48  ;;  %v1015_v56 = vmul.f32 -1.442695, %v242_v48 }
 0x3ad   :  { %v238_v51 = vpop.f32.mrf.mxu1 }
 0x3ae   :  { %v243_v52 = vadd.f32 %v238_v51, %v193_v50 }
 0x3af   :  { %v1080_v53 = vpop.f32.mrf.mxu1 }
 0x3b0   :  { %1171 = vtanh.f32 %v243_v52  ;;  %v1016_v57 = vmul.f32 -1.442695, %v243_v52 }
 0x3b1   :  { %1173 = vpow2.f32 %v1015_v56 }
 0x3b2   :  { %1175 = vpow2.f32 %v1016_v57  ;;  %v394_v57 = vld [vmem:[#allocation4 + $0x30] sm:$0xff] }
 0x3b9   :  { %v1170_v54 = vpop.eup %1169 }
 0x3ba   :  { %262 = vrot.lane.b32.xlu1 %v1170_v54, %s1346_s15 }
 0x3bd   :  { %v1172_v55 = vpop.eup %1171 }
 0x3be   :  { %264 = vrot.lane.b32.xlu0 %v1172_v55, %s1346_s15  ;;  %v1174_v58 = vpop.eup %1173 }
 0x3bf   :  { %v250_v59 = vadd.f32 1.0, %v1174_v58  ;;  %v1176_v60 = vpop.eup %1175 }
 0x3c0   :  { %v251_v61 = vadd.f32 1.0, %v1176_v60 }
 0x3c1   :  { %1177 = vrcp.f32 %v250_v59 }
 0x3c2   :  { %1179 = vrcp.f32 %v251_v61  ;;  %v395_v61 = vld [vmem:[#allocation4 + $0x38] sm:$0xff] }
 0x3ce   :  { %v1178_v62 = vpop.eup %1177 }
 0x3cf   :  { %v1180_v4 = vpop.eup %1179  ;;  %v258_v7 = vmul.f32 %v1178_v62, %v177_v34 }
 0x3d0   :  { %v259_v10 = vmul.f32 %v1180_v4, %v178_v37 }
 0x42c   :  { %v263_v63 = vpop.permute.xlu1 %262 }
 0x42d   :  { %v268_v3 = vmul.f32 %v1178_v62, %v263_v63 }
 0x42f   :  { %272 = vrot.lane.b32.xlu1 %v268_v3, %s1354_s0 }
 0x430   :  { %v265_v5 = vpop.permute.xlu0 %264 }
 0x431   :  { %v269_v6 = vmul.f32 %v1180_v4, %v265_v5 }
 0x433   :  { %274 = vrot.lane.b32.xlu0 %v269_v6, %s1354_s0 }
 0x4a1   :  { %v273_v8 = vpop.permute.xlu1 %272 }
 0x4a2   :  { %v278_v9 = vadd.f32 %v273_v8, %v258_v7 }
 0x4a4   :  { %1181 = vtanh.f32 %v278_v9 }
 0x4a5   :  { %v275_v11 = vpop.permute.xlu0 %274 }
 0x4a6   :  { %v279_v12 = vadd.f32 %v275_v11, %v259_v10 }
 0x4a8   :  { %1183 = vtanh.f32 %v279_v12 }
 0x4b1   :  { %v1182_v13 = vpop.eup %1181 }
 0x4b2   :  { %284 = vrot.lane.b32.xlu1 %v1182_v13, %s1346_s15 }
 0x4b5   :  { %v1184_v14 = vpop.eup %1183 }
 0x4b6   :  { %286 = vrot.lane.b32.xlu0 %v1184_v14, %s1346_s15 }
 0x524   :  { %v285_v15 = vpop.permute.xlu1 %284 }
 0x525   :  { %v290_v17 = vmul.f32 %v1178_v62, %v285_v15 }
 0x528   :  { %v287_v16 = vpop.permute.xlu0 %286 }
 0x529   :  { %v291_v18 = vmul.f32 %v1180_v4, %v287_v16 }
 0x52b   :  { %v295_v19 = vpack.c.bf16 %v291_v18, %v290_v17 }
 0x52d   :  { %297 = vrot.lane.b32.xlu1 %v295_v19, %s1354_s0 }
 0x59f   :  { %v298_v20 = vpop.permute.xlu1 %297 }
 0x5a0   :  { %1086 = vmatmul.mubr.msk.bf16.vlgmr.msra.gmra.mxu0 %vm60_vm0, %v298_v20 }
 0x5a1   :  { %1098 = vmatpush3.bf16.msra.mxu0 %v1401_v1  ;;  %1101 = vmatprep.mubr.msk.bf16.mxu0 %vm1353_vm1, %v1352_v0 }
 0x5a2   :  { %1099 = vmatprep.subr.bf16.mxu0 %v1352_v0 }
 0x5a5   :  { %1100 = vmatpush3.bf16.msra.mxu0 %v1403_v2 }
 0x5a6   :  { %1113 = vmatprep.subr.bf16.mxu0 %v1352_v0 }
 0x660   :  { %v336_v22 = vpop.f32.mrf.mxu0 }
 0x661   :  { %v343_v23 = vadd.f32 %v336_v22, %v293_v21 }
 0x662   :  { %v1087_v24 = vpop.f32.mrf.mxu0 }
 0x663   :  { %1185 = vtanh.f32 %v343_v23  ;;  %v1018_v31 = vmul.f32 -1.442695, %v343_v23 }
 0x664   :  { %v339_v26 = vpop.f32.mrf.mxu0 }
 0x665   :  { %v344_v27 = vadd.f32 %v339_v26, %v294_v25 }
 0x666   :  { %v1088_v28 = vpop.f32.mrf.mxu0 }
 0x667   :  { %1187 = vtanh.f32 %v344_v27  ;;  %v1019_v32 = vmul.f32 -1.442695, %v344_v27 }
 0x668   :  { %1189 = vpow2.f32 %v1018_v31 }
 0x669   :  { %1191 = vpow2.f32 %v1019_v32  ;;  %v495_v32 = vld [vmem:[#allocation4 + $0x40] sm:$0xff] }
 0x670   :  { %v1186_v29 = vpop.eup %1185 }
 0x671   :  { %363 = vrot.lane.b32.xlu0 %v1186_v29, %s1346_s15 }
 0x674   :  { %v1188_v30 = vpop.eup %1187 }
 0x675   :  { %365 = vrot.lane.b32.xlu1 %v1188_v30, %s1346_s15  ;;  %v1190_v33 = vpop.eup %1189 }
 0x676   :  { %v351_v34 = vadd.f32 1.0, %v1190_v33  ;;  %v1192_v35 = vpop.eup %1191 }
 0x677   :  { %v352_v36 = vadd.f32 1.0, %v1192_v35 }
 0x678   :  { %1193 = vrcp.f32 %v351_v34 }
 0x679   :  { %1195 = vrcp.f32 %v352_v36  ;;  %v496_v36 = vld [vmem:[#allocation4 + $0x48] sm:$0xff] }
 0x685   :  { %v1194_v37 = vpop.eup %1193 }
 0x686   :  { %v1196_v40 = vpop.eup %1195  ;;  %v359_v43 = vmul.f32 %v1194_v37, %v278_v9 }
 0x687   :  { %v360_v46 = vmul.f32 %v1196_v40, %v279_v12 }
 0x6e3   :  { %v364_v38 = vpop.permute.xlu0 %363 }
 0x6e4   :  { %v369_v39 = vmul.f32 %v1194_v37, %v364_v38 }
 0x6e6   :  { %373 = vrot.lane.b32.xlu0 %v369_v39, %s1354_s0 }
 0x6e7   :  { %v366_v41 = vpop.permute.xlu1 %365 }
 0x6e8   :  { %v370_v42 = vmul.f32 %v1196_v40, %v366_v41 }
 0x6ea   :  { %375 = vrot.lane.b32.xlu1 %v370_v42, %s1354_s0 }
 0x758   :  { %v374_v44 = vpop.permute.xlu0 %373 }
 0x759   :  { %v379_v45 = vadd.f32 %v374_v44, %v359_v43 }
 0x75b   :  { %1197 = vtanh.f32 %v379_v45 }
 0x75c   :  { %v376_v47 = vpop.permute.xlu1 %375 }
 0x75d   :  { %v380_v48 = vadd.f32 %v376_v47, %v360_v46 }
 0x75f   :  { %1199 = vtanh.f32 %v380_v48 }
 0x768   :  { %v1198_v49 = vpop.eup %1197 }
 0x769   :  { %385 = vrot.lane.b32.xlu0 %v1198_v49, %s1346_s15 }
 0x76c   :  { %v1200_v50 = vpop.eup %1199 }
 0x76d   :  { %387 = vrot.lane.b32.xlu1 %v1200_v50, %s1346_s15 }
 0x7db   :  { %v386_v51 = vpop.permute.xlu0 %385 }
 0x7dc   :  { %v391_v53 = vmul.f32 %v1194_v37, %v386_v51 }
 0x7df   :  { %v388_v52 = vpop.permute.xlu1 %387 }
 0x7e0   :  { %v392_v54 = vmul.f32 %v1196_v40, %v388_v52 }
 0x7e2   :  { %v396_v55 = vpack.c.bf16 %v392_v54, %v391_v53 }
 0x7e4   :  { %398 = vrot.lane.b32.xlu0 %v396_v55, %s1354_s0 }
 0x856   :  { %v399_v56 = vpop.permute.xlu0 %398 }
 0x857   :  { %1094 = vmatmul.mubr.msk.bf16.vlgmr.msra.gmra.mxu1 %vm60_vm0, %v399_v56 }
 0x858   :  { %1106 = vmatpush3.bf16.msra.mxu1 %v1401_v1  ;;  %1109 = vmatprep.mubr.msk.bf16.mxu1 %vm1353_vm1, %v1352_v0 }
 0x859   :  { %1107 = vmatprep.subr.bf16.mxu1 %v1352_v0 }
 0x85c   :  { %1108 = vmatpush3.bf16.msra.mxu1 %v1403_v2 }
 0x85d   :  { %1121 = vmatprep.subr.bf16.mxu1 %v1352_v0 }
 0x917   :  { %v437_v58 = vpop.f32.mrf.mxu1 }
 0x918   :  { %v444_v59 = vadd.f32 %v437_v58, %v394_v57 }
 0x919   :  { %v1095_v60 = vpop.f32.mrf.mxu1 }
 0x91a   :  { %1201 = vtanh.f32 %v444_v59  ;;  %v1021_v6 = vmul.f32 -1.442695, %v444_v59 }
 0x91b   :  { %v440_v62 = vpop.f32.mrf.mxu1 }
 0x91c   :  { %v445_v63 = vadd.f32 %v440_v62, %v395_v61 }
 0x91d   :  { %v1096_v3 = vpop.f32.mrf.mxu1 }
 0x91e   :  { %1203 = vtanh.f32 %v445_v63  ;;  %v1022_v7 = vmul.f32 -1.442695, %v445_v63 }
 0x91f   :  { %1205 = vpow2.f32 %v1021_v6 }
 0x920   :  { %1207 = vpow2.f32 %v1022_v7  ;;  %v596_v7 = vld [vmem:[#allocation4 + $0x50] sm:$0xff] }
 0x927   :  { %v1202_v4 = vpop.eup %1201 }
 0x928   :  { %464 = vrot.lane.b32.xlu1 %v1202_v4, %s1346_s15 }
 0x92b   :  { %v1204_v5 = vpop.eup %1203 }
 0x92c   :  { %466 = vrot.lane.b32.xlu0 %v1204_v5, %s1346_s15  ;;  %v1206_v8 = vpop.eup %1205 }
 0x92d   :  { %v452_v9 = vadd.f32 1.0, %v1206_v8  ;;  %v1208_v10 = vpop.eup %1207 }
 0x92e   :  { %v453_v11 = vadd.f32 1.0, %v1208_v10 }
 0x92f   :  { %1209 = vrcp.f32 %v452_v9 }
 0x930   :  { %1211 = vrcp.f32 %v453_v11  ;;  %v597_v11 = vld [vmem:[#allocation4 + $0x58] sm:$0xff] }
 0x93c   :  { %v1210_v12 = vpop.eup %1209 }
 0x93d   :  { %v1212_v15 = vpop.eup %1211  ;;  %v460_v18 = vmul.f32 %v1210_v12, %v379_v45 }
 0x93e   :  { %v461_v21 = vmul.f32 %v1212_v15, %v380_v48 }
 0x99a   :  { %v465_v13 = vpop.permute.xlu1 %464 }
 0x99b   :  { %v470_v14 = vmul.f32 %v1210_v12, %v465_v13 }
 0x99d   :  { %474 = vrot.lane.b32.xlu1 %v470_v14, %s1354_s0 }
 0x99e   :  { %v467_v16 = vpop.permute.xlu0 %466 }
 0x99f   :  { %v471_v17 = vmul.f32 %v1212_v15, %v467_v16 }
 0x9a1   :  { %476 = vrot.lane.b32.xlu0 %v471_v17, %s1354_s0 }
 0xa0f   :  { %v475_v19 = vpop.permute.xlu1 %474 }
 0xa10   :  { %v480_v20 = vadd.f32 %v475_v19, %v460_v18 }
 0xa12   :  { %1213 = vtanh.f32 %v480_v20 }
 0xa13   :  { %v477_v22 = vpop.permute.xlu0 %476 }
 0xa14   :  { %v481_v23 = vadd.f32 %v477_v22, %v461_v21 }
 0xa16   :  { %1215 = vtanh.f32 %v481_v23 }
 0xa1f   :  { %v1214_v24 = vpop.eup %1213 }
 0xa20   :  { %486 = vrot.lane.b32.xlu1 %v1214_v24, %s1346_s15 }
 0xa23   :  { %v1216_v25 = vpop.eup %1215 }
 0xa24   :  { %488 = vrot.lane.b32.xlu0 %v1216_v25, %s1346_s15 }
 0xa92   :  { %v487_v26 = vpop.permute.xlu1 %486 }
 0xa93   :  { %v492_v28 = vmul.f32 %v1210_v12, %v487_v26 }
 0xa96   :  { %v489_v27 = vpop.permute.xlu0 %488 }
 0xa97   :  { %v493_v29 = vmul.f32 %v1212_v15, %v489_v27 }
 0xa99   :  { %v497_v30 = vpack.c.bf16 %v493_v29, %v492_v28 }
 0xa9b   :  { %499 = vrot.lane.b32.xlu1 %v497_v30, %s1354_s0 }
 0xb0d   :  { %v500_v31 = vpop.permute.xlu1 %499 }
 0xb0e   :  { %1102 = vmatmul.mubr.msk.bf16.vlgmr.msra.gmra.mxu0 %vm60_vm0, %v500_v31 }
 0xb0f   :  { %1114 = vmatpush3.bf16.msra.mxu0 %v1401_v1  ;;  %1117 = vmatprep.mubr.msk.bf16.mxu0 %vm1353_vm1, %v1352_v0 }
 0xb10   :  { %1115 = vmatprep.subr.bf16.mxu0 %v1352_v0 }
 0xb13   :  { %1116 = vmatpush3.bf16.msra.mxu0 %v1403_v2 }
 0xb14   :  { %1129 = vmatprep.subr.mxu0 %v1352_v0 }
 0xbce   :  { %v538_v33 = vpop.f32.mrf.mxu0 }
 0xbcf   :  { %v545_v34 = vadd.f32 %v538_v33, %v495_v32 }
 0xbd0   :  { %v1103_v35 = vpop.f32.mrf.mxu0 }
 0xbd1   :  { %1217 = vtanh.f32 %v545_v34  ;;  %v1024_v42 = vmul.f32 -1.442695, %v545_v34 }
 0xbd2   :  { %v541_v37 = vpop.f32.mrf.mxu0 }
 0xbd3   :  { %v546_v38 = vadd.f32 %v541_v37, %v496_v36 }
 0xbd4   :  { %v1104_v39 = vpop.f32.mrf.mxu0 }
 0xbd5   :  { %1219 = vtanh.f32 %v546_v38  ;;  %v1025_v43 = vmul.f32 -1.442695, %v546_v38 }
 0xbd6   :  { %1221 = vpow2.f32 %v1024_v42 }
 0xbd7   :  { %1223 = vpow2.f32 %v1025_v43 }
 0xbde   :  { %v1218_v40 = vpop.eup %1217 }
 0xbdf   :  { %565 = vrot.lane.b32.xlu0 %v1218_v40, %s1346_s15 }
 0xbe2   :  { %v1220_v41 = vpop.eup %1219 }
 0xbe3   :  { %567 = vrot.lane.b32.xlu1 %v1220_v41, %s1346_s15  ;;  %v1222_v44 = vpop.eup %1221  ;;  %v697_v41 = vld [vmem:[#allocation4 + $0x60] sm:$0xff] }
 0xbe4   :  { %v553_v45 = vadd.f32 1.0, %v1222_v44  ;;  %v1224_v46 = vpop.eup %1223 }
 0xbe5   :  { %v554_v47 = vadd.f32 1.0, %v1224_v46 }
 0xbe6   :  { %1225 = vrcp.f32 %v553_v45  ;;  %v698_v45 = vld [vmem:[#allocation4 + $0x68] sm:$0xff] }
 0xbe7   :  { %1227 = vrcp.f32 %v554_v47 }
 0xbf3   :  { %v1226_v48 = vpop.eup %1225 }
 0xbf4   :  { %v1228_v51 = vpop.eup %1227  ;;  %v561_v54 = vmul.f32 %v1226_v48, %v480_v20 }
 0xbf5   :  { %v562_v57 = vmul.f32 %v1228_v51, %v481_v23 }
 0xc51   :  { %v566_v49 = vpop.permute.xlu0 %565 }
 0xc52   :  { %v571_v50 = vmul.f32 %v1226_v48, %v566_v49 }
 0xc54   :  { %575 = vrot.lane.b32.xlu0 %v571_v50, %s1354_s0 }
 0xc55   :  { %v568_v52 = vpop.permute.xlu1 %567 }
 0xc56   :  { %v572_v53 = vmul.f32 %v1228_v51, %v568_v52 }
 0xc58   :  { %577 = vrot.lane.b32.xlu1 %v572_v53, %s1354_s0 }
 0xcc6   :  { %v576_v55 = vpop.permute.xlu0 %575 }
 0xcc7   :  { %v581_v56 = vadd.f32 %v576_v55, %v561_v54 }
 0xcc9   :  { %1229 = vtanh.f32 %v581_v56 }
 0xcca   :  { %v578_v58 = vpop.permute.xlu1 %577 }
 0xccb   :  { %v582_v59 = vadd.f32 %v578_v58, %v562_v57 }
 0xccd   :  { %1231 = vtanh.f32 %v582_v59 }
 0xcd6   :  { %v1230_v60 = vpop.eup %1229 }
 0xcd7   :  { %587 = vrot.lane.b32.xlu0 %v1230_v60, %s1346_s15 }
 0xcda   :  { %v1232_v61 = vpop.eup %1231 }
 0xcdb   :  { %589 = vrot.lane.b32.xlu1 %v1232_v61, %s1346_s15 }
 0xd49   :  { %v588_v62 = vpop.permute.xlu0 %587 }
 0xd4a   :  { %v593_v3 = vmul.f32 %v1226_v48, %v588_v62 }
 0xd4d   :  { %v590_v63 = vpop.permute.xlu1 %589 }
 0xd4e   :  { %v594_v4 = vmul.f32 %v1228_v51, %v590_v63 }
 0xd50   :  { %v598_v5 = vpack.c.bf16 %v594_v4, %v593_v3 }
 0xd52   :  { %600 = vrot.lane.b32.xlu0 %v598_v5, %s1354_s0 }
 0xdc4   :  { %v601_v6 = vpop.permute.xlu0 %600 }
 0xdc5   :  { %1110 = vmatmul.mubr.msk.bf16.vlgmr.msra.gmra.mxu1 %vm60_vm0, %v601_v6 }
 0xdc6   :  { %1122 = vmatpush3.bf16.msra.mxu1 %v1401_v1  ;;  %1125 = vmatprep.mubr.msk.bf16.mxu1 %vm1353_vm1, %v1352_v0 }
 0xdc7   :  { %1123 = vmatprep.subr.bf16.mxu1 %v1352_v0 }
 0xdca   :  { %1124 = vmatpush3.bf16.msra.mxu1 %v1403_v2 }
 0xe85   :  { %v639_v8 = vpop.f32.mrf.mxu1 }
 0xe86   :  { %v646_v9 = vadd.f32 %v639_v8, %v596_v7 }
 0xe87   :  { %v1111_v10 = vpop.f32.mrf.mxu1 }
 0xe88   :  { %1233 = vtanh.f32 %v646_v9  ;;  %v1027_v16 = vmul.f32 -1.442695, %v646_v9 }
 0xe89   :  { %v642_v12 = vpop.f32.mrf.mxu1 }
 0xe8a   :  { %v647_v13 = vadd.f32 %v642_v12, %v597_v11 }
 0xe8b   :  { %v1112_v14 = vpop.f32.mrf.mxu1 }
 0xe8c   :  { %1235 = vtanh.f32 %v647_v13  ;;  %v1028_v17 = vmul.f32 -1.442695, %v647_v13 }
 0xe8d   :  { %1237 = vpow2.f32 %v1027_v16 }
 0xe8e   :  { %1239 = vpow2.f32 %v1028_v17 }
 0xe95   :  { %v1234_v15 = vpop.eup %1233 }
 0xe96   :  { %666 = vrot.lane.b32.xlu1 %v1234_v15, %s1346_s15 }
 0xe99   :  { %v1236_v1 = vpop.eup %1235 }
 0xe9a   :  { %668 = vrot.lane.b32.xlu0 %v1236_v1, %s1346_s15  ;;  %v1238_v2 = vpop.eup %1237  ;;  %v798_v1 = vld [vmem:[#allocation4 + $0x70] sm:$0xff] }
 0xe9b   :  { %v654_v18 = vadd.f32 1.0, %v1238_v2  ;;  %v1240_v19 = vpop.eup %1239 }
 0xe9c   :  { %v655_v20 = vadd.f32 1.0, %v1240_v19 }
 0xe9d   :  { %1241 = vrcp.f32 %v654_v18 }
 0xe9e   :  { %1243 = vrcp.f32 %v655_v20 }
 0xeaa   :  { %v1242_v21 = vpop.eup %1241 }
 0xeab   :  { %v1244_v24 = vpop.eup %1243  ;;  %v662_v27 = vmul.f32 %v1242_v21, %v581_v56 }
 0xeac   :  { %v663_v30 = vmul.f32 %v1244_v24, %v582_v59 }
 0xf08   :  { %v667_v22 = vpop.permute.xlu1 %666 }
 0xf09   :  { %v672_v23 = vmul.f32 %v1242_v21, %v667_v22 }
 0xf0b   :  { %676 = vrot.lane.b32.xlu1 %v672_v23, %s1354_s0 }
 0xf0c   :  { %v669_v25 = vpop.permute.xlu0 %668 }
 0xf0d   :  { %v673_v26 = vmul.f32 %v1244_v24, %v669_v25 }
 0xf0f   :  { %678 = vrot.lane.b32.xlu0 %v673_v26, %s1354_s0 }
 0xf7d   :  { %v677_v28 = vpop.permute.xlu1 %676 }
 0xf7e   :  { %v682_v29 = vadd.f32 %v677_v28, %v662_v27 }
 0xf80   :  { %1245 = vtanh.f32 %v682_v29 }
 0xf81   :  { %v679_v31 = vpop.permute.xlu0 %678 }
 0xf82   :  { %v683_v32 = vadd.f32 %v679_v31, %v663_v30 }
 0xf84   :  { %1247 = vtanh.f32 %v683_v32 }
 0xf8d   :  { %v1246_v33 = vpop.eup %1245 }
 0xf8e   :  { %688 = vrot.lane.b32.xlu1 %v1246_v33, %s1346_s15 }
 0xf91   :  { %v1248_v34 = vpop.eup %1247 }
 0xf92   :  { %690 = vrot.lane.b32.xlu0 %v1248_v34, %s1346_s15 }
0x1000   :  { %v689_v35 = vpop.permute.xlu1 %688 }
0x1001   :  { %v694_v37 = vmul.f32 %v1242_v21, %v689_v35 }
0x1004   :  { %v691_v36 = vpop.permute.xlu0 %690 }
0x1005   :  { %v695_v38 = vmul.f32 %v1244_v24, %v691_v36  ;;  %v799_v24 = vld [vmem:[#allocation4 + $0x78] sm:$0xff] }
0x1007   :  { %v699_v39 = vpack.c.bf16 %v695_v38, %v694_v37 }
0x1009   :  { %701 = vrot.lane.b32.xlu1 %v699_v39, %s1354_s0  ;;  %v924_v39 = vld [vmem:[#allocation8 + $0x18] sm:$0xff] }
0x107b   :  { %v702_v40 = vpop.permute.xlu1 %701 }
0x107c   :  { %1118 = vmatmul.mubr.msk.bf16.vlgmr.msra.gmra.mxu0 %vm60_vm0, %v702_v40  ;;  %v923_v40 = vld [vmem:[#allocation8 + $0x10] sm:$0xff] }
0x107d   :  { %1137 = vmatprep.mubr.msk.f32.mxu0 %vm1353_vm1, %v1352_v0  ;;  %1130 = vmatpush3.msra.mxu0 %v924_v39 }
0x107e   :  { %1131 = vmatprep.subr.mxu0 %v1352_v0 }
0x107f   :  { %1132 = vmatpush3.msra.mxu0 %v923_v40 }
0x1080   :  { %1133 = vmatprep.subr.mxu0 %v1352_v0 }
0x113c   :  { %v740_v42 = vpop.f32.mrf.mxu0 }
0x113d   :  { %v747_v43 = vadd.f32 %v740_v42, %v697_v41  ;;  %v922_v41 = vld [vmem:[#allocation8 + $0x8] sm:$0xff]  ;;  %v921_v42 = vld [vmem:[#allocation8] sm:$0xff] }
0x113e   :  { %v1119_v44 = vpop.f32.mrf.mxu0  ;;  %1134 = vmatpush3.msra.mxu0 %v922_v41 }
0x113f   :  { %1249 = vtanh.f32 %v747_v43  ;;  %v1030_v51 = vmul.f32 -1.442695, %v747_v43  ;;  %1135 = vmatprep.subr.mxu0 %v1352_v0 }
0x1140   :  { %v743_v46 = vpop.f32.mrf.mxu0  ;;  %1136 = vmatpush3.msra.mxu0 %v921_v42 }
0x1141   :  { %v748_v47 = vadd.f32 %v743_v46, %v698_v45 }
0x1142   :  { %v1120_v48 = vpop.f32.mrf.mxu0 }
0x1143   :  { %1251 = vtanh.f32 %v748_v47  ;;  %v1031_v52 = vmul.f32 -1.442695, %v748_v47 }
0x1144   :  { %1253 = vpow2.f32 %v1030_v51 }
0x1145   :  { %1255 = vpow2.f32 %v1031_v52 }
0x114c   :  { %v1250_v49 = vpop.eup %1249 }
0x114d   :  { %767 = vrot.lane.b32.xlu0 %v1250_v49, %s1346_s15 }
0x1150   :  { %v1252_v50 = vpop.eup %1251 }
0x1151   :  { %769 = vrot.lane.b32.xlu1 %v1252_v50, %s1346_s15  ;;  %v1254_v53 = vpop.eup %1253 }
0x1152   :  { %v755_v54 = vadd.f32 1.0, %v1254_v53  ;;  %v1256_v55 = vpop.eup %1255 }
0x1153   :  { %v756_v56 = vadd.f32 1.0, %v1256_v55 }
0x1154   :  { %1257 = vrcp.f32 %v755_v54 }
0x1155   :  { %1259 = vrcp.f32 %v756_v56 }
0x1161   :  { %v1258_v57 = vpop.eup %1257 }
0x1162   :  { %v1260_v60 = vpop.eup %1259  ;;  %v763_v63 = vmul.f32 %v1258_v57, %v682_v29 }
0x1163   :  { %v764_v5 = vmul.f32 %v1260_v60, %v683_v32 }
0x11bf   :  { %v768_v58 = vpop.permute.xlu0 %767 }
0x11c0   :  { %v773_v59 = vmul.f32 %v1258_v57, %v768_v58 }
0x11c2   :  { %777 = vrot.lane.b32.xlu0 %v773_v59, %s1354_s0 }
0x11c3   :  { %v770_v61 = vpop.permute.xlu1 %769 }
0x11c4   :  { %v774_v62 = vmul.f32 %v1260_v60, %v770_v61 }
0x11c6   :  { %779 = vrot.lane.b32.xlu1 %v774_v62, %s1354_s0 }
0x1234   :  { %v778_v3 = vpop.permute.xlu0 %777 }
0x1235   :  { %v783_v4 = vadd.f32 %v778_v3, %v763_v63 }
0x1237   :  { %1261 = vtanh.f32 %v783_v4 }
0x1238   :  { %v780_v6 = vpop.permute.xlu1 %779 }
0x1239   :  { %v1505_v7 = vadd.f32 %v780_v6, %v764_v5 }
0x123b   :  { %1263 = vtanh.f32 %v1505_v7 }
0x1244   :  { %v1262_v8 = vpop.eup %1261 }
0x1245   :  { %789 = vrot.lane.b32.xlu0 %v1262_v8, %s1346_s15 }
0x1248   :  { %v1264_v9 = vpop.eup %1263 }
0x1249   :  { %791 = vrot.lane.b32.xlu1 %v1264_v9, %s1346_s15 }
0x12b7   :  { %v790_v10 = vpop.permute.xlu0 %789 }
0x12b8   :  { %v795_v12 = vmul.f32 %v1258_v57, %v790_v10 }
0x12bb   :  { %v792_v11 = vpop.permute.xlu1 %791 }
0x12bc   :  { %v796_v13 = vmul.f32 %v1260_v60, %v792_v11 }
0x12be   :  { %v800_v14 = vpack.c.bf16 %v796_v13, %v795_v12 }
0x12c0   :  { %802 = vrot.lane.b32.xlu0 %v800_v14, %s1354_s0 }
0x1332   :  { %v803_v15 = vpop.permute.xlu0 %802 }
0x1333   :  { %1126 = vmatmul.mubr.msk.bf16.vlgmr.msra.gmra.mxu1 %vm60_vm0, %v803_v15 }
0x13f3   :  { %v841_v16 = vpop.f32.mrf.mxu1 }
0x13f4   :  { %v848_v17 = vadd.f32 %v841_v16, %v798_v1 }
0x13f5   :  { %v1127_v2 = vpop.f32.mrf.mxu1 }
0x13f6   :  { %1265 = vtanh.f32 %v848_v17  ;;  %v1033_v21 = vmul.f32 -1.442695, %v848_v17 }
0x13f7   :  { %v844_v18 = vpop.f32.mrf.mxu1 }
0x13f8   :  { %1267 = vpow2.f32 %v1033_v21  ;;  %v849_v25 = vadd.f32 %v844_v18, %v799_v24 }
0x13f9   :  { %v1128_v19 = vpop.f32.mrf.mxu1 }
0x13fa   :  { %v1034_v30 = vmul.f32 -1.442695, %v849_v25 }
0x1403   :  { %v1266_v20 = vpop.eup %1265 }
0x1404   :  { %868 = vrot.lane.b32.xlu1 %v1266_v20, %s1346_s15 }
0x1405   :  { %v1268_v22 = vpop.eup %1267 }
0x1406   :  { %v856_v23 = vadd.f32 1.0, %v1268_v22 }
0x1408   :  { %1269 = vrcp.f32 %v856_v23 }
0x1409   :  { %1271 = vtanh.f32 %v849_v25 }
0x140a   :  { %1273 = vpow2.f32 %v1034_v30 }
0x1415   :  { %v1270_v26 = vpop.eup %1269 }
0x1416   :  { %v1272_v29 = vpop.eup %1271  ;;  %v864_v33 = vmul.f32 %v1270_v26, %v783_v4 }
0x1417   :  { %v1274_v31 = vpop.eup %1273 }
0x1418   :  { %v857_v32 = vadd.f32 1.0, %v1274_v31 }
0x141a   :  { %1275 = vrcp.f32 %v857_v32 }
0x1427   :  { %v1276_v36 = vpop.eup %1275 }
0x1428   :  { %v865_v44 = vmul.f32 %v1276_v36, %v1505_v7 }
0x1476   :  { %v869_v27 = vpop.permute.xlu1 %868 }
0x1477   :  { %v874_v28 = vmul.f32 %v1270_v26, %v869_v27 }
0x1479   :  { %878 = vrot.lane.b32.xlu0 %v874_v28, %s1354_s0 }
0x147d   :  { %870 = vrot.lane.b32.xlu0 %v1272_v29, %s1346_s15 }
0x14eb   :  { %v879_v34 = vpop.permute.xlu0 %878 }
0x14ec   :  { %v884_v35 = vadd.f32 %v879_v34, %v864_v33 }
0x14ee   :  { %1277 = vtanh.f32 %v884_v35 }
0x14ef   :  { %v871_v37 = vpop.permute.xlu0 %870 }
0x14f0   :  { %v875_v38 = vmul.f32 %v1276_v36, %v871_v37 }
0x14f2   :  { %880 = vrot.lane.b32.xlu0 %v875_v38, %s1354_s0 }
0x14fb   :  { %v1278_v43 = vpop.eup %1277 }
0x14fc   :  { %890 = vrot.lane.b32.xlu1 %v1278_v43, %s1346_s15 }
0x1564   :  { %v881_v45 = vpop.permute.xlu0 %880 }
0x1565   :  { %v885_v46 = vadd.f32 %v881_v45, %v865_v44 }
0x1567   :  { %1279 = vtanh.f32 %v885_v46 }
0x156e   :  { %v891_v47 = vpop.permute.xlu1 %890 }
0x156f   :  { %v896_v48 = vmul.f32 %v1270_v26, %v891_v47 }
0x1571   :  { %900 = vrot.lane.b32.xlu1 %v896_v48, %s1354_s0 }
0x1574   :  { %v1280_v49 = vpop.eup %1279 }
0x1575   :  { %892 = vrot.lane.b32.xlu1 %v1280_v49, %s1346_s15 }
0x15e3   :  { %v901_v50 = vpop.permute.xlu1 %900 }
0x15e4   :  { %906 = vst.msk [vmem:[#allocation2] sm:$0xff] %vm60_vm0, %v901_v50  ;;  %1138 = vmatmul.mubr.msk.f32.vlgmr.msra.gmra.mxu0 %vm60_vm0, %v901_v50 }
0x15e7   :  { %v893_v0 = vpop.permute.xlu1 %892 }
0x15e8   :  { %v897_v51 = vmul.f32 %v1276_v36, %v893_v0 }
0x15ea   :  { %902 = vrot.lane.b32.xlu0 %v897_v51, %s1354_s0 }
0x15ee   :  { %910 = vrot.lane.b32.xlu0 %v884_v35, %s1355_s2 }
0x15f2   :  { %912 = vrot.lane.b32.xlu0 %v885_v46, %s1355_s2 }
0x165c   :  { %v903_v52 = vpop.permute.xlu0 %902 }
0x165d   :  { %907 = vst.msk [vmem:[#allocation2 + $0x8] sm:$0xff] %vm60_vm0, %v903_v52 }
0x1660   :  { %v911_v53 = vpop.permute.xlu0 %910 }
0x1661   :  { %916 = vst.msk [vmem:[#allocation3] sm:$0xff] %vm60_vm0, %v911_v53 }
0x1664   :  { %v913_v54 = vpop.permute.xlu0 %912 }
0x1665   :  { %917 = vst.msk [vmem:[#allocation3 + $0x8] sm:$0xff] %vm60_vm0, %v913_v54 }
0x16a4   :  { %v993_v55 = vpop.f32.mrf.mxu0 }
0x16a5   :  { %v997_v56 = vmul.f32 %v993_v55, %v903_v52 }
0x16a6   :  { %v1139_v57 = vpop.f32.mrf.mxu0 }
0x16a7   :  { %v998_v58 = vsel %vm60_vm0, %v997_v56, 0.0 }
0x16a8   :  { %999 = vadd.xlane.f32.xlu1 %v998_v58 }
0x1731   :  { %v1000_v59 = vpop.xlane.xlu1 %999 }
0x1732   :  { %1002 = vst.msk [vmem:[%s1536_s3] sm:$0xff] %vm1001_vm2, %v1000_v59 }
0x1733   :  { %1007 = vsyncpa [#allocation5], 1 }
0x1734   :  { %1008 = vsyncpa [#allocation7], 1 }

</bundles_post_ra>
